<compile_context>
chip_gen: v6e
topology: v6e:2x2x1
jax: 0.10.0
libtpu: 0.0.40
codegen_flags: <defaults>
</compile_context>

<pallas_src>
import numpy as np
import jax
import jax.numpy as jnp
from jax.experimental import pallas as pl
from jax.experimental.pallas import tpu as pltpu

# ----------------------------- config --------------------------------------
N = 2          # batch (number of union RoIs); scale this up in production
C_X = 4        # roi feature channels
C_GEO = 4      # geometric feature channels
H = W = 8      # spatial size
NUM_CONV = 2
CONV_DIM = 8
NUM_FC = 2
FC_DIM = 32

C_IN = C_GEO + C_X               # conv1 input channels (after concat) = 8
# The padded activation scratch keeps a per-pixel lane group of width C_IN; conv2
# writes its CONV_DIM channels back into the same groups, so the layout is only
# valid while C_IN == CONV_DIM (see review's correctness note).
assert C_IN == CONV_DIM, "width-lowered layout requires C_IN == CONV_DIM"

TILE_N = N                       # RoIs per grid step (use a multiple of 8 when N is large)
assert N % TILE_N == 0

ROWS_M = H * TILE_N              # 16  matmul M rows per step: (y, n)
LANES_IN = (W + 2) * C_IN        # 80  padded lanes: (w_in, ci)
LANES_OUT = W * CONV_DIM         # 64  conv output lanes: (x, co)


# --------------------------- fused Pallas kernel ----------------------------
def fused_head_kernel(xin_ref, t1_ref, b1_ref, t2_ref, b2_ref,
                      fw1_ref, fb1_ref, fw2_ref, fb2_ref,
                      o_ref, pad_ref):
    """Entire RelationConvFCHead forward for one RoI tile, VMEM-resident.

    xin_ref:  (H, TILE_N, W*C_IN)        concat(geo, x), rows (y,n), lanes (x,ci)
    t{1,2}:   (3, (W+2)*C_IN, W*CONV_DIM) banded conv weights, one slab per ky
    b{1,2}:   (1, W*CONV_DIM)            conv bias tiled over x
    fw1:      (H, W*CONV_DIM, FC_DIM)    FC1 weight with NCHW flatten folded in
    fb1:      (1, FC_DIM)
    fw2:      (FC_DIM, FC_DIM)           pre-transposed FC2 weight
    fb2:      (1, FC_DIM)
    o_ref:    (TILE_N, FC_DIM)           final output (only HBM store)
    pad_ref:  ((H+2)*TILE_N, (W+2)*C_IN) zero-padded activation scratch (VMEM)
    """
    # Zero the padded buffer; its border ring stays zero for both convs.
    pad_ref[...] = jnp.zeros_like(pad_ref)

    # Single interior store of the pre-concatenated (geo, x) activations.
    pad_ref[TILE_N:TILE_N + ROWS_M, C_IN:C_IN + W * C_IN] = (
        xin_ref[...].reshape(ROWS_M, W * C_IN))

    def conv3x3_relu(t_ref, b_ref):
        # 3x3 conv = 3 accumulated matmuls (one per ky); the kx/ci part of the
        # receptive field is folded into the banded weight, so each LHS is just
        # a contiguous row-window of the padded scratch.
        acc = jnp.zeros((ROWS_M, LANES_OUT), jnp.float32)
        for dy in range(3):
            lhs = pad_ref[dy * TILE_N: dy * TILE_N + ROWS_M, :]      # (16, 80)
            acc = acc + jnp.dot(lhs, t_ref[dy],
                                preferred_element_type=jnp.float32)   # (16, 64)
        return jnp.maximum(acc + b_ref[...], 0.0)

    # conv1 + relu; write back into the scratch interior for conv2.
    h1 = conv3x3_relu(t1_ref, b1_ref)
    pad_ref[TILE_N:TILE_N + ROWS_M, C_IN:C_IN + LANES_OUT] = h1

    # conv2 + relu; rows (y, n), lanes (x, co).
    h2 = conv3x3_relu(t2_ref, b2_ref)

    # fc1: the PyTorch NCHW flatten is folded into fw1's layout, so we just
    # accumulate one (TILE_N, 64) @ (64, 32) dot per output row y.
    acc = jnp.zeros((TILE_N, FC_DIM), jnp.float32)
    for y in range(H):
        acc = acc + jnp.dot(h2[y * TILE_N:(y + 1) * TILE_N, :], fw1_ref[y],
                            preferred_element_type=jnp.float32)
    f1 = jnp.maximum(acc + fb1_ref[...], 0.0)                         # (TILE_N, 32)

    # fc2 + relu.
    f2 = jnp.dot(f1, fw2_ref[...], preferred_element_type=jnp.float32)
    f2 = jnp.maximum(f2 + fb2_ref[...], 0.0)
    o_ref[...] = f2.astype(o_ref.dtype)


# ------------------------------ param prep ----------------------------------
def _conv_to_banded(w_oihw):
    """OIHW (Co,Ci,3,3) conv weight -> banded (3, (W+2)*Ci, W*Co) matmul weight.

    T[ky, w_in*Ci + ci, x*Co + co] = w[co, ci, ky, w_in - x]  if 0 <= w_in - x < 3
                                   = 0                        otherwise
    """
    w = np.asarray(w_oihw)
    co, ci, kh, kw = w.shape
    t = np.zeros((kh, (W + 2) * ci, W * co), np.float32)
    for dy in range(kh):
        for x in range(W):
            for kx in range(kw):
                w_in = x + kx
                t[dy, w_in * ci:(w_in + 1) * ci, x * co:(x + 1) * co] = w[:, :, dy, kx].T
    return jnp.asarray(t)


def prepare_params(params):
    """One-time conversion of PyTorch-layout params to kernel-friendly layouts."""
    (w1, b1), (w2, b2) = params["convs"]
    (fw1, fb1), (fw2, fb2) = params["fcs"]

    t1 = _conv_to_banded(w1)
    t2 = _conv_to_banded(w2)
    bb1 = jnp.tile(b1, W).reshape(1, W * CONV_DIM)     # bias tiled over x: (1, 64)
    bb2 = jnp.tile(b2, W).reshape(1, W * CONV_DIM)

    # Fold torch.flatten's (c, y, x) ordering into fw1: row order becomes
    # (y; x, c) to match the kernel's conv-output layout.
    wfc1 = (fw1.T.reshape(CONV_DIM, H, W, FC_DIM)      # rows were (c, y, x)
            .transpose(1, 2, 0, 3)                     # -> (y, x, c, f)
            .reshape(H, W * CONV_DIM, FC_DIM))

    return (t1, bb1, t2, bb2,
            wfc1, fb1.reshape(1, -1),
            fw2.T, fb2.reshape(1, -1))


# ------------------------------ wrapper -------------------------------------
def _const_spec(shape):
    return pl.BlockSpec(shape, lambda i: (0,) * len(shape))


@jax.jit
def relation_conv_fc_head_forward(x_nchw, geo_nchw, kparams):
    n = x_nchw.shape[0]
    # Channel concat (geo first) fused by XLA with the layout change:
    # kernel layout is rows (y, n), lanes (x, c)  -> (H, N, W*C_IN).
    h = jnp.concatenate([geo_nchw, x_nchw], axis=1)                  # (N, C_IN, H, W)
    xin = jnp.transpose(h, (2, 0, 3, 1)).reshape(H, n, W * C_IN)     # (H, N, 64)

    in_specs = [
        pl.BlockSpec((H, TILE_N, W * C_IN), lambda i: (0, i, 0)),
        _const_spec((3, LANES_IN, LANES_OUT)),
        _const_spec((1, LANES_OUT)),
        _const_spec((3, LANES_IN, LANES_OUT)),
        _const_spec((1, LANES_OUT)),
        _const_spec((H, LANES_OUT, FC_DIM)),
        _const_spec((1, FC_DIM)),
        _const_spec((FC_DIM, FC_DIM)),
        _const_spec((1, FC_DIM)),
    ]
    return pl.pallas_call(
        fused_head_kernel,
        out_shape=jax.ShapeDtypeStruct((n, FC_DIM), jnp.float32),
        grid=(n // TILE_N,),
        in_specs=in_specs,
        out_specs=pl.BlockSpec((TILE_N, FC_DIM), lambda i: (i, 0)),
        scratch_shapes=[
            pltpu.VMEM(((H + 2) * TILE_N, LANES_IN), jnp.float32),
        ],
        compiler_params=pltpu.CompilerParams(
            dimension_semantics=("parallel",)),   # shards RoI tiles across v7x's 2 TCs
    )(xin, *kparams)


# ---------------------- pure-JAX reference (for checking) -------------------
def reference_forward(x_nchw, geo_nchw, params):
    h = jnp.concatenate([geo_nchw, x_nchw], axis=1)
    for (w, b) in params["convs"]:
        h = jax.lax.conv_general_dilated(
            h, w, (1, 1), ((1, 1), (1, 1)),
            dimension_numbers=("NCHW", "OIHW", "NCHW"))
        h = jax.nn.relu(h + b[None, :, None, None])
    h = h.reshape(h.shape[0], -1)
    for (w, b) in params["fcs"]:
        h = jax.nn.relu(h @ w.T + b[None, :])
    return h


# ----------------------------- param init -----------------------------------
def init_params(key):
    convs = []
    in_ch = C_GEO + C_X
    for _ in range(NUM_CONV):
        key, kw = jax.random.split(key)
        fan_in = in_ch * 9
        # c2_msra_fill: normal(0, sqrt(2/fan_in)), bias = 0
        w = jax.random.normal(kw, (CONV_DIM, in_ch, 3, 3), jnp.float32)
        w = w * (2.0 / fan_in) ** 0.5
        b = jnp.zeros((CONV_DIM,), jnp.float32)
        convs.append((w, b))
        in_ch = CONV_DIM
    fcs = []
    in_dim = CONV_DIM * H * W
    for _ in range(NUM_FC):
        key, kw = jax.random.split(key)
        # c2_xavier_fill-ish: scaled normal, bias = 0
        w = jax.random.normal(kw, (FC_DIM, in_dim), jnp.float32)
        w = w * (1.0 / in_dim) ** 0.5
        b = jnp.zeros((FC_DIM,), jnp.float32)
        fcs.append((w, b))
        in_dim = FC_DIM
    return {"convs": convs, "fcs": fcs}


# -------------------------------- main ---------------------------------------
if __name__ == "__main__":
    key = jax.random.PRNGKey(0)
    kp, kx, kg = jax.random.split(key, 3)
    params = init_params(kp)
    kparams = prepare_params(params)   # kernel-friendly weight layouts, done once

    x = jax.random.normal(kx, (N, C_X, H, W), jnp.float32)        # NCHW
    geo_feat = jax.random.normal(kg, (N, C_GEO, H, W), jnp.float32)

    out = jax.block_until_ready(relation_conv_fc_head_forward(x, geo_feat, kparams))
    ref = jax.block_until_ready(reference_forward(x, geo_feat, params))

    assert out.shape == (N, FC_DIM), out.shape
    assert jnp.allclose(out, ref, rtol=1e-4, atol=1e-4), (
        float(jnp.max(jnp.abs(out - ref))))
    print("KERNEL_OK")
</pallas_src>

<mosaic_0001>
module attributes {stable_mosaic.version = 11 : i64} {
  func.func @fused_head_kernel(%arg0: i32, %arg1: memref<8x2x64xf32, #tpu.memory_space<vmem>>, %arg2: memref<3x80x64xf32, #tpu.memory_space<vmem>>, %arg3: memref<1x64xf32, #tpu.memory_space<vmem>>, %arg4: memref<3x80x64xf32, #tpu.memory_space<vmem>>, %arg5: memref<1x64xf32, #tpu.memory_space<vmem>>, %arg6: memref<8x64x32xf32, #tpu.memory_space<vmem>>, %arg7: memref<1x32xf32, #tpu.memory_space<vmem>>, %arg8: memref<32x32xf32, #tpu.memory_space<vmem>>, %arg9: memref<1x32xf32, #tpu.memory_space<vmem>>, %arg10: memref<2x32xf32, #tpu.memory_space<vmem>>, %arg11: memref<20x80xf32, #tpu.memory_space<vmem>>) attributes {dimension_semantics = [#tpu.dimension_semantics<parallel>], iteration_bounds = array<i64: 1>, scalar_prefetch = 0 : i64, scratch_operands = 1 : i64, tpu.core_type = #tpu.core_type<tc>, window_params = [{transform_indices = @transform_0, window_bounds = array<i64: 8, 2, 64>}, {pipeline_mode = #tpu.pipeline_mode<synchronous>, transform_indices = @transform_1, window_bounds = array<i64: 3, 80, 64>}, {pipeline_mode = #tpu.pipeline_mode<synchronous>, transform_indices = @transform_2, window_bounds = array<i64: 1, 64>}, {pipeline_mode = #tpu.pipeline_mode<synchronous>, transform_indices = @transform_3, window_bounds = array<i64: 3, 80, 64>}, {pipeline_mode = #tpu.pipeline_mode<synchronous>, transform_indices = @transform_4, window_bounds = array<i64: 1, 64>}, {pipeline_mode = #tpu.pipeline_mode<synchronous>, transform_indices = @transform_5, window_bounds = array<i64: 8, 64, 32>}, {pipeline_mode = #tpu.pipeline_mode<synchronous>, transform_indices = @transform_6, window_bounds = array<i64: 1, 32>}, {pipeline_mode = #tpu.pipeline_mode<synchronous>, transform_indices = @transform_7, window_bounds = array<i64: 32, 32>}, {pipeline_mode = #tpu.pipeline_mode<synchronous>, transform_indices = @transform_8, window_bounds = array<i64: 1, 32>}, {transform_indices = @transform_9, window_bounds = array<i64: 2, 32>}]} {
    %cst = arith.constant 0.000000e+00 : f32
    %0 = vector.broadcast %cst : f32 to vector<20x80xf32>
    %c0 = arith.constant 0 : index
    %c0_0 = arith.constant 0 : index
    %1 = vector.load %arg11[%c0, %c0_0] : memref<20x80xf32, #tpu.memory_space<vmem>>, vector<20x80xf32>
    tpu.vector_store %arg11[%c0, %c0_0], %0 {strides = array<i32>} : memref<20x80xf32, #tpu.memory_space<vmem>>, vector<20x80xf32>,
    %c0_1 = arith.constant 0 : index
    %c0_2 = arith.constant 0 : index
    %c0_3 = arith.constant 0 : index
    %2 = vector.load %arg1[%c0_1, %c0_2, %c0_3] : memref<8x2x64xf32, #tpu.memory_space<vmem>>, vector<8x2x64xf32>
    %3 = vector.shape_cast %2 : vector<8x2x64xf32> to vector<16x64xf32>
    %c2 = arith.constant 2 : index
    %c8 = arith.constant 8 : index
    %4 = vector.load %arg11[%c2, %c8] : memref<20x80xf32, #tpu.memory_space<vmem>>, vector<16x64xf32>
    tpu.vector_store %arg11[%c2, %c8], %3 {strides = array<i32>} : memref<20x80xf32, #tpu.memory_space<vmem>>, vector<16x64xf32>,
    %cst_4 = arith.constant 0.000000e+00 : f32
    %5 = vector.broadcast %cst_4 : f32 to vector<16x64xf32>
    %c0_5 = arith.constant 0 : index
    %c0_6 = arith.constant 0 : index
    %6 = vector.load %arg11[%c0_5, %c0_6] : memref<20x80xf32, #tpu.memory_space<vmem>>, vector<16x80xf32>
    %c0_7 = arith.constant 0 : index
    %c0_8 = arith.constant 0 : index
    %c0_9 = arith.constant 0 : index
    %7 = vector.load %arg2[%c0_7, %c0_8, %c0_9] : memref<3x80x64xf32, #tpu.memory_space<vmem>>, vector<1x80x64xf32>
    %8 = vector.shape_cast %7 : vector<1x80x64xf32> to vector<80x64xf32>
    %cst_10 = arith.constant dense<0.000000e+00> : vector<16x64xf32>
    %9 = tpu.matmul %6, %8, %cst_10 {dimension_numbers = #tpu.dot_dimension_numbers<[1], [0], [0], [1], [0, 0, 1, 1], [], []>} : vector<16x80xf32>, vector<80x64xf32>, vector<16x64xf32> -> vector<16x64xf32>
    %10 = arith.addf %5, %9 : vector<16x64xf32>
    %c2_11 = arith.constant 2 : index
    %c0_12 = arith.constant 0 : index
    %11 = vector.load %arg11[%c2_11, %c0_12] : memref<20x80xf32, #tpu.memory_space<vmem>>, vector<16x80xf32>
    %c1 = arith.constant 1 : index
    %c0_13 = arith.constant 0 : index
    %c0_14 = arith.constant 0 : index
    %12 = vector.load %arg2[%c1, %c0_13, %c0_14] : memref<3x80x64xf32, #tpu.memory_space<vmem>>, vector<1x80x64xf32>
    %13 = vector.shape_cast %12 : vector<1x80x64xf32> to vector<80x64xf32>
    %cst_15 = arith.constant dense<0.000000e+00> : vector<16x64xf32>
    %14 = tpu.matmul %11, %13, %cst_15 {dimension_numbers = #tpu.dot_dimension_numbers<[1], [0], [0], [1], [0, 0, 1, 1], [], []>} : vector<16x80xf32>, vector<80x64xf32>, vector<16x64xf32> -> vector<16x64xf32>
    %15 = arith.addf %10, %14 : vector<16x64xf32>
    %c4 = arith.constant 4 : index
    %c0_16 = arith.constant 0 : index
    %16 = vector.load %arg11[%c4, %c0_16] : memref<20x80xf32, #tpu.memory_space<vmem>>, vector<16x80xf32>
    %c2_17 = arith.constant 2 : index
    %c0_18 = arith.constant 0 : index
    %c0_19 = arith.constant 0 : index
    %17 = vector.load %arg2[%c2_17, %c0_18, %c0_19] : memref<3x80x64xf32, #tpu.memory_space<vmem>>, vector<1x80x64xf32>
    %18 = vector.shape_cast %17 : vector<1x80x64xf32> to vector<80x64xf32>
    %cst_20 = arith.constant dense<0.000000e+00> : vector<16x64xf32>
    %19 = tpu.matmul %16, %18, %cst_20 {dimension_numbers = #tpu.dot_dimension_numbers<[1], [0], [0], [1], [0, 0, 1, 1], [], []>} : vector<16x80xf32>, vector<80x64xf32>, vector<16x64xf32> -> vector<16x64xf32>
    %20 = arith.addf %15, %19 : vector<16x64xf32>
    %c0_21 = arith.constant 0 : index
    %c0_22 = arith.constant 0 : index
    %21 = vector.load %arg3[%c0_21, %c0_22] : memref<1x64xf32, #tpu.memory_space<vmem>>, vector<1x64xf32>
    %22 = vector.broadcast %21 : vector<1x64xf32> to vector<16x64xf32>
    %23 = arith.addf %20, %22 : vector<16x64xf32>
    %cst_23 = arith.constant 0.000000e+00 : f32
    %24 = vector.broadcast %cst_23 : f32 to vector<16x64xf32>
    %25 = arith.maximumf %23, %24 : vector<16x64xf32>
    %c2_24 = arith.constant 2 : index
    %c8_25 = arith.constant 8 : index
    %26 = vector.load %arg11[%c2_24, %c8_25] : memref<20x80xf32, #tpu.memory_space<vmem>>, vector<16x64xf32>
    tpu.vector_store %arg11[%c2_24, %c8_25], %25 {strides = array<i32>} : memref<20x80xf32, #tpu.memory_space<vmem>>, vector<16x64xf32>,
    %cst_26 = arith.constant 0.000000e+00 : f32
    %27 = vector.broadcast %cst_26 : f32 to vector<16x64xf32>
    %c0_27 = arith.constant 0 : index
    %c0_28 = arith.constant 0 : index
    %28 = vector.load %arg11[%c0_27, %c0_28] : memref<20x80xf32, #tpu.memory_space<vmem>>, vector<16x80xf32>
    %c0_29 = arith.constant 0 : index
    %c0_30 = arith.constant 0 : index
    %c0_31 = arith.constant 0 : index
    %29 = vector.load %arg4[%c0_29, %c0_30, %c0_31] : memref<3x80x64xf32, #tpu.memory_space<vmem>>, vector<1x80x64xf32>
    %30 = vector.shape_cast %29 : vector<1x80x64xf32> to vector<80x64xf32>
    %cst_32 = arith.constant dense<0.000000e+00> : vector<16x64xf32>
    %31 = tpu.matmul %28, %30, %cst_32 {dimension_numbers = #tpu.dot_dimension_numbers<[1], [0], [0], [1], [0, 0, 1, 1], [], []>} : vector<16x80xf32>, vector<80x64xf32>, vector<16x64xf32> -> vector<16x64xf32>
    %32 = arith.addf %27, %31 : vector<16x64xf32>
    %c2_33 = arith.constant 2 : index
    %c0_34 = arith.constant 0 : index
    %33 = vector.load %arg11[%c2_33, %c0_34] : memref<20x80xf32, #tpu.memory_space<vmem>>, vector<16x80xf32>
    %c1_35 = arith.constant 1 : index
    %c0_36 = arith.constant 0 : index
    %c0_37 = arith.constant 0 : index
    %34 = vector.load %arg4[%c1_35, %c0_36, %c0_37] : memref<3x80x64xf32, #tpu.memory_space<vmem>>, vector<1x80x64xf32>
    %35 = vector.shape_cast %34 : vector<1x80x64xf32> to vector<80x64xf32>
    %cst_38 = arith.constant dense<0.000000e+00> : vector<16x64xf32>
    %36 = tpu.matmul %33, %35, %cst_38 {dimension_numbers = #tpu.dot_dimension_numbers<[1], [0], [0], [1], [0, 0, 1, 1], [], []>} : vector<16x80xf32>, vector<80x64xf32>, vector<16x64xf32> -> vector<16x64xf32>
    %37 = arith.addf %32, %36 : vector<16x64xf32>
    %c4_39 = arith.constant 4 : index
    %c0_40 = arith.constant 0 : index
    %38 = vector.load %arg11[%c4_39, %c0_40] : memref<20x80xf32, #tpu.memory_space<vmem>>, vector<16x80xf32>
    %c2_41 = arith.constant 2 : index
    %c0_42 = arith.constant 0 : index
    %c0_43 = arith.constant 0 : index
    %39 = vector.load %arg4[%c2_41, %c0_42, %c0_43] : memref<3x80x64xf32, #tpu.memory_space<vmem>>, vector<1x80x64xf32>
    %40 = vector.shape_cast %39 : vector<1x80x64xf32> to vector<80x64xf32>
    %cst_44 = arith.constant dense<0.000000e+00> : vector<16x64xf32>
    %41 = tpu.matmul %38, %40, %cst_44 {dimension_numbers = #tpu.dot_dimension_numbers<[1], [0], [0], [1], [0, 0, 1, 1], [], []>} : vector<16x80xf32>, vector<80x64xf32>, vector<16x64xf32> -> vector<16x64xf32>
    %42 = arith.addf %37, %41 : vector<16x64xf32>
    %c0_45 = arith.constant 0 : index
    %c0_46 = arith.constant 0 : index
    %43 = vector.load %arg5[%c0_45, %c0_46] : memref<1x64xf32, #tpu.memory_space<vmem>>, vector<1x64xf32>
    %44 = vector.broadcast %43 : vector<1x64xf32> to vector<16x64xf32>
    %45 = arith.addf %42, %44 : vector<16x64xf32>
    %cst_47 = arith.constant 0.000000e+00 : f32
    %46 = vector.broadcast %cst_47 : f32 to vector<16x64xf32>
    %47 = arith.maximumf %45, %46 : vector<16x64xf32>
    %cst_48 = arith.constant 0.000000e+00 : f32
    %48 = vector.broadcast %cst_48 : f32 to vector<2x32xf32>
    %49 = vector.extract_strided_slice %47 {offsets = [0, 0], sizes = [2, 64], strides = [1, 1]} : vector<16x64xf32> to vector<2x64xf32>
    %c0_49 = arith.constant 0 : index
    %c0_50 = arith.constant 0 : index
    %c0_51 = arith.constant 0 : index
    %50 = vector.load %arg6[%c0_49, %c0_50, %c0_51] : memref<8x64x32xf32, #tpu.memory_space<vmem>>, vector<1x64x32xf32>
    %51 = vector.shape_cast %50 : vector<1x64x32xf32> to vector<64x32xf32>
    %cst_52 = arith.constant dense<0.000000e+00> : vector<2x32xf32>
    %52 = tpu.matmul %49, %51, %cst_52 {dimension_numbers = #tpu.dot_dimension_numbers<[1], [0], [0], [1], [0, 0, 1, 1], [], []>} : vector<2x64xf32>, vector<64x32xf32>, vector<2x32xf32> -> vector<2x32xf32>
    %53 = arith.addf %48, %52 : vector<2x32xf32>
    %54 = vector.extract_strided_slice %47 {offsets = [2, 0], sizes = [2, 64], strides = [1, 1]} : vector<16x64xf32> to vector<2x64xf32>
    %c1_53 = arith.constant 1 : index
    %c0_54 = arith.constant 0 : index
    %c0_55 = arith.constant 0 : index
    %55 = vector.load %arg6[%c1_53, %c0_54, %c0_55] : memref<8x64x32xf32, #tpu.memory_space<vmem>>, vector<1x64x32xf32>
    %56 = vector.shape_cast %55 : vector<1x64x32xf32> to vector<64x32xf32>
    %cst_56 = arith.constant dense<0.000000e+00> : vector<2x32xf32>
    %57 = tpu.matmul %54, %56, %cst_56 {dimension_numbers = #tpu.dot_dimension_numbers<[1], [0], [0], [1], [0, 0, 1, 1], [], []>} : vector<2x64xf32>, vector<64x32xf32>, vector<2x32xf32> -> vector<2x32xf32>
    %58 = arith.addf %53, %57 : vector<2x32xf32>
    %59 = vector.extract_strided_slice %47 {offsets = [4, 0], sizes = [2, 64], strides = [1, 1]} : vector<16x64xf32> to vector<2x64xf32>
    %c2_57 = arith.constant 2 : index
    %c0_58 = arith.constant 0 : index
    %c0_59 = arith.constant 0 : index
    %60 = vector.load %arg6[%c2_57, %c0_58, %c0_59] : memref<8x64x32xf32, #tpu.memory_space<vmem>>, vector<1x64x32xf32>
    %61 = vector.shape_cast %60 : vector<1x64x32xf32> to vector<64x32xf32>
    %cst_60 = arith.constant dense<0.000000e+00> : vector<2x32xf32>
    %62 = tpu.matmul %59, %61, %cst_60 {dimension_numbers = #tpu.dot_dimension_numbers<[1], [0], [0], [1], [0, 0, 1, 1], [], []>} : vector<2x64xf32>, vector<64x32xf32>, vector<2x32xf32> -> vector<2x32xf32>
    %63 = arith.addf %58, %62 : vector<2x32xf32>
    %64 = vector.extract_strided_slice %47 {offsets = [6, 0], sizes = [2, 64], strides = [1, 1]} : vector<16x64xf32> to vector<2x64xf32>
    %c3 = arith.constant 3 : index
    %c0_61 = arith.constant 0 : index
    %c0_62 = arith.constant 0 : index
    %65 = vector.load %arg6[%c3, %c0_61, %c0_62] : memref<8x64x32xf32, #tpu.memory_space<vmem>>, vector<1x64x32xf32>
    %66 = vector.shape_cast %65 : vector<1x64x32xf32> to vector<64x32xf32>
    %cst_63 = arith.constant dense<0.000000e+00> : vector<2x32xf32>
    %67 = tpu.matmul %64, %66, %cst_63 {dimension_numbers = #tpu.dot_dimension_numbers<[1], [0], [0], [1], [0, 0, 1, 1], [], []>} : vector<2x64xf32>, vector<64x32xf32>, vector<2x32xf32> -> vector<2x32xf32>
    %68 = arith.addf %63, %67 : vector<2x32xf32>
    %69 = vector.extract_strided_slice %47 {offsets = [8, 0], sizes = [2, 64], strides = [1, 1]} : vector<16x64xf32> to vector<2x64xf32>
    %c4_64 = arith.constant 4 : index
    %c0_65 = arith.constant 0 : index
    %c0_66 = arith.constant 0 : index
    %70 = vector.load %arg6[%c4_64, %c0_65, %c0_66] : memref<8x64x32xf32, #tpu.memory_space<vmem>>, vector<1x64x32xf32>
    %71 = vector.shape_cast %70 : vector<1x64x32xf32> to vector<64x32xf32>
    %cst_67 = arith.constant dense<0.000000e+00> : vector<2x32xf32>
    %72 = tpu.matmul %69, %71, %cst_67 {dimension_numbers = #tpu.dot_dimension_numbers<[1], [0], [0], [1], [0, 0, 1, 1], [], []>} : vector<2x64xf32>, vector<64x32xf32>, vector<2x32xf32> -> vector<2x32xf32>
    %73 = arith.addf %68, %72 : vector<2x32xf32>
    %74 = vector.extract_strided_slice %47 {offsets = [10, 0], sizes = [2, 64], strides = [1, 1]} : vector<16x64xf32> to vector<2x64xf32>
    %c5 = arith.constant 5 : index
    %c0_68 = arith.constant 0 : index
    %c0_69 = arith.constant 0 : index
    %75 = vector.load %arg6[%c5, %c0_68, %c0_69] : memref<8x64x32xf32, #tpu.memory_space<vmem>>, vector<1x64x32xf32>
    %76 = vector.shape_cast %75 : vector<1x64x32xf32> to vector<64x32xf32>
    %cst_70 = arith.constant dense<0.000000e+00> : vector<2x32xf32>
    %77 = tpu.matmul %74, %76, %cst_70 {dimension_numbers = #tpu.dot_dimension_numbers<[1], [0], [0], [1], [0, 0, 1, 1], [], []>} : vector<2x64xf32>, vector<64x32xf32>, vector<2x32xf32> -> vector<2x32xf32>
    %78 = arith.addf %73, %77 : vector<2x32xf32>
    %79 = vector.extract_strided_slice %47 {offsets = [12, 0], sizes = [2, 64], strides = [1, 1]} : vector<16x64xf32> to vector<2x64xf32>
    %c6 = arith.constant 6 : index
    %c0_71 = arith.constant 0 : index
    %c0_72 = arith.constant 0 : index
    %80 = vector.load %arg6[%c6, %c0_71, %c0_72] : memref<8x64x32xf32, #tpu.memory_space<vmem>>, vector<1x64x32xf32>
    %81 = vector.shape_cast %80 : vector<1x64x32xf32> to vector<64x32xf32>
    %cst_73 = arith.constant dense<0.000000e+00> : vector<2x32xf32>
    %82 = tpu.matmul %79, %81, %cst_73 {dimension_numbers = #tpu.dot_dimension_numbers<[1], [0], [0], [1], [0, 0, 1, 1], [], []>} : vector<2x64xf32>, vector<64x32xf32>, vector<2x32xf32> -> vector<2x32xf32>
    %83 = arith.addf %78, %82 : vector<2x32xf32>
    %84 = vector.extract_strided_slice %47 {offsets = [14, 0], sizes = [2, 64], strides = [1, 1]} : vector<16x64xf32> to vector<2x64xf32>
    %c7 = arith.constant 7 : index
    %c0_74 = arith.constant 0 : index
    %c0_75 = arith.constant 0 : index
    %85 = vector.load %arg6[%c7, %c0_74, %c0_75] : memref<8x64x32xf32, #tpu.memory_space<vmem>>, vector<1x64x32xf32>
    %86 = vector.shape_cast %85 : vector<1x64x32xf32> to vector<64x32xf32>
    %cst_76 = arith.constant dense<0.000000e+00> : vector<2x32xf32>
    %87 = tpu.matmul %84, %86, %cst_76 {dimension_numbers = #tpu.dot_dimension_numbers<[1], [0], [0], [1], [0, 0, 1, 1], [], []>} : vector<2x64xf32>, vector<64x32xf32>, vector<2x32xf32> -> vector<2x32xf32>
    %88 = arith.addf %83, %87 : vector<2x32xf32>
    %c0_77 = arith.constant 0 : index
    %c0_78 = arith.constant 0 : index
    %89 = vector.load %arg7[%c0_77, %c0_78] : memref<1x32xf32, #tpu.memory_space<vmem>>, vector<1x32xf32>
    %90 = vector.broadcast %89 : vector<1x32xf32> to vector<2x32xf32>
    %91 = arith.addf %88, %90 : vector<2x32xf32>
    %cst_79 = arith.constant 0.000000e+00 : f32
    %92 = vector.broadcast %cst_79 : f32 to vector<2x32xf32>
    %93 = arith.maximumf %91, %92 : vector<2x32xf32>
    %c0_80 = arith.constant 0 : index
    %c0_81 = arith.constant 0 : index
    %94 = vector.load %arg8[%c0_80, %c0_81] : memref<32x32xf32, #tpu.memory_space<vmem>>, vector<32x32xf32>
    %cst_82 = arith.constant dense<0.000000e+00> : vector<2x32xf32>
    %95 = tpu.matmul %93, %94, %cst_82 {dimension_numbers = #tpu.dot_dimension_numbers<[1], [0], [0], [1], [0, 0, 1, 1], [], []>} : vector<2x32xf32>, vector<32x32xf32>, vector<2x32xf32> -> vector<2x32xf32>
    %c0_83 = arith.constant 0 : index
    %c0_84 = arith.constant 0 : index
    %96 = vector.load %arg9[%c0_83, %c0_84] : memref<1x32xf32, #tpu.memory_space<vmem>>, vector<1x32xf32>
    %97 = vector.broadcast %96 : vector<1x32xf32> to vector<2x32xf32>
    %98 = arith.addf %95, %97 : vector<2x32xf32>
    %cst_85 = arith.constant 0.000000e+00 : f32
    %99 = vector.broadcast %cst_85 : f32 to vector<2x32xf32>
    %100 = arith.maximumf %98, %99 : vector<2x32xf32>
    %c0_86 = arith.constant 0 : index
    %c0_87 = arith.constant 0 : index
    %101 = vector.load %arg10[%c0_86, %c0_87] : memref<2x32xf32, #tpu.memory_space<vmem>>, vector<2x32xf32>
    tpu.vector_store %arg10[%c0_86, %c0_87], %100 {strides = array<i32>} : memref<2x32xf32, #tpu.memory_space<vmem>>, vector<2x32xf32>,
    return
  }
  func.func @transform_0(%arg0: i32) -> (i32, i32, i32) {
    %c0_i32 = arith.constant 0 : i32
    %c0_i32_0 = arith.constant 0 : i32
    %c0_i32_1 = arith.constant 0 : i32
    return %c0_i32, %arg0, %c0_i32_0 : i32, i32, i32
  }
  func.func @transform_1(%arg0: i32) -> (i32, i32, i32) {
    %c0_i32 = arith.constant 0 : i32
    %c0_i32_0 = arith.constant 0 : i32
    %c0_i32_1 = arith.constant 0 : i32
    %c0_i32_2 = arith.constant 0 : i32
    return %c0_i32, %c0_i32_0, %c0_i32_1 : i32, i32, i32
  }
  func.func @transform_2(%arg0: i32) -> (i32, i32) {
    %c0_i32 = arith.constant 0 : i32
    %c0_i32_0 = arith.constant 0 : i32
    %c0_i32_1 = arith.constant 0 : i32
    return %c0_i32, %c0_i32_0 : i32, i32
  }
  func.func @transform_3(%arg0: i32) -> (i32, i32, i32) {
    %c0_i32 = arith.constant 0 : i32
    %c0_i32_0 = arith.constant 0 : i32
    %c0_i32_1 = arith.constant 0 : i32
    %c0_i32_2 = arith.constant 0 : i32
    return %c0_i32, %c0_i32_0, %c0_i32_1 : i32, i32, i32
  }
  func.func @transform_4(%arg0: i32) -> (i32, i32) {
    %c0_i32 = arith.constant 0 : i32
    %c0_i32_0 = arith.constant 0 : i32
    %c0_i32_1 = arith.constant 0 : i32
    return %c0_i32, %c0_i32_0 : i32, i32
  }
  func.func @transform_5(%arg0: i32) -> (i32, i32, i32) {
    %c0_i32 = arith.constant 0 : i32
    %c0_i32_0 = arith.constant 0 : i32
    %c0_i32_1 = arith.constant 0 : i32
    %c0_i32_2 = arith.constant 0 : i32
    return %c0_i32, %c0_i32_0, %c0_i32_1 : i32, i32, i32
  }
  func.func @transform_6(%arg0: i32) -> (i32, i32) {
    %c0_i32 = arith.constant 0 : i32
    %c0_i32_0 = arith.constant 0 : i32
    %c0_i32_1 = arith.constant 0 : i32
    return %c0_i32, %c0_i32_0 : i32, i32
  }
  func.func @transform_7(%arg0: i32) -> (i32, i32) {
    %c0_i32 = arith.constant 0 : i32
    %c0_i32_0 = arith.constant 0 : i32
    %c0_i32_1 = arith.constant 0 : i32
    return %c0_i32, %c0_i32_0 : i32, i32
  }
  func.func @transform_8(%arg0: i32) -> (i32, i32) {
    %c0_i32 = arith.constant 0 : i32
    %c0_i32_0 = arith.constant 0 : i32
    %c0_i32_1 = arith.constant 0 : i32
    return %c0_i32, %c0_i32_0 : i32, i32
  }
  func.func @transform_9(%arg0: i32) -> (i32, i32) {
    %c0_i32 = arith.constant 0 : i32
    %c0_i32_0 = arith.constant 0 : i32
    return %arg0, %c0_i32 : i32, i32
  }
}

</mosaic_0001>

<bundles_post_ra>
// kernel: relation_conv_fc_head_forward.1
= control target key start
LH: loop header
LB: loop body
LE: loop exit
PB: predicated region body
PF: predicated region fallthrough
CT: control target
= control target key end

     0   :  { %v59_v3 = vlaneseq  ;;  %v2066_v6 = vmov 1983009808   ;;  %vm33_vm0 = vcmask 654336   ;;  %v2067_v24 = vmov 0.0   ;;  %s2682_s0 = inlined_call_operand.vmem [shape: f32[8,2,64], index: 0, kind: input, shape index: {}]   ;;  %s2683_s1 = inlined_call_operand.vmem [shape: f32[3,80,64], index: 1, kind: input, shape index: {}]   ;;  %s2684_s2 = inlined_call_operand.vmem [shape: f32[1,64], index: 2, kind: input, shape index: {}]   ;;  %s2685_s3 = inlined_call_operand.vmem [shape: f32[3,80,64], index: 3, kind: input, shape index: {}]   ;;  %s2686_s4 = inlined_call_operand.vmem [shape: f32[1,64], index: 4, kind: input, shape index: {}]   ;;  %s2687_s5 = inlined_call_operand.vmem [shape: f32[8,64,32], index: 5, kind: input, shape index: {}]   ;;  %s2688_s6 = inlined_call_operand.vmem [shape: f32[1,32], index: 6, kind: input, shape index: {}]   ;;  %s2689_s7 = inlined_call_operand.vmem [shape: f32[32,32], index: 7, kind: input, shape index: {}]   ;;  %s2690_s8 = inlined_call_operand.vmem [shape: f32[1,32], index: 8, kind: input, shape index: {}]   ;;  %s2691_s9 = inlined_call_operand.hbm [shape: f32[2,32], index: 9, kind: output, shape index: {}]  }
   0x1   :  { %v38_v0 = vld [vmem:[%s2682_s0] sm:$0x3]  ;;  %v39_v1 = vld [vmem:[%s2682_s0 + $0x2] sm:$0x3]  ;;  %v40_v2 = vld [vmem:[%s2682_s0 + $0x4] sm:$0x3]  ;;  %v57_v7 = vunpack.c.l.s4 %v2066_v6 }
   0x2   :  { %v41_v4 = vld [vmem:[%s2682_s0 + $0x6] sm:$0x3]  ;;  %v1477_v5 = vld [vmem:[%s2683_s1 + $0x98] sm:$0xff]  ;;  %v60_v8 = vshrl.u32 %v59_v3, 7  ;;  %v42_v9 = vld [vmem:[%s2682_s0 + $0x8] sm:$0x3]  ;;  %v54_v12 = vcombine.low %v38_v0, %v39_v1 }
   0x3   :  { %v43_v10 = vld [vmem:[%s2682_s0 + $0xa] sm:$0x3]  ;;  %1738 = vmatprep.subr.mxu0 %v1477_v5  ;;  %v55_v13 = vcombine.low %v40_v2, %v41_v4  ;;  %v44_v14 = vld [vmem:[%s2682_s0 + $0xc] sm:$0x3]  ;;  %v45_v15 = vld [vmem:[%s2682_s0 + $0xe] sm:$0x3]  ;;  %v58_v18 = vunpack.c.0.s8 %v57_v7 }
   0x4   :  { %v108_v11 = vld [vmem:[%s2683_s1 + $0x48] sm:$0xff]  ;;  %v71_v16 = vcombine.low %v42_v9, %v43_v10  ;;  %1739 = vmatpush3.msra.mxu0 %v1477_v5  ;;  %v1476_v17 = vld [vmem:[%s2683_s1 + $0x90] sm:$0xff]  ;;  %v72_v19 = vcombine.low %v44_v14, %v45_v15  ;;  %v107_v20 = vld [vmem:[%s2683_s1 + $0x40] sm:$0xff]  ;;  %34 = vst.msk [vmem:[#allocation2] sm:$0xff] %vm33_vm0, %v2067_v24  ;;  %vm36_vm1 = vcmask 650240  }
   0x5   :  { %1761 = vmatprep.subr.mxu1 %v108_v11  ;;  %1740 = vmatprep.subr.mxu0 %v1476_v17  ;;  %v1475_v21 = vld [vmem:[%s2683_s1 + $0x88] sm:$0xff]  ;;  %v106_v22 = vld [vmem:[%s2683_s1 + $0x38] sm:$0xff]  ;;  %v1474_v23 = vld [vmem:[%s2683_s1 + $0x80] sm:$0xff]  ;;  %35 = vst.msk [vmem:[#allocation2 + $0x8] sm:$0xff] %vm33_vm0, %v2067_v24  ;;  %v61_v25 = vsub.s32 %v58_v18, %v60_v8 }
   0x6   :  { %1762 = vmatpush3.msra.mxu1 %v108_v11  ;;  %1741 = vmatpush3.msra.mxu0 %v1476_v17  ;;  %37 = vst.msk [vmem:[#allocation2 + $0x10] sm:$0xf] %vm36_vm1, %v2067_v24  ;;  %v105_v26 = vld [vmem:[%s2683_s1 + $0x30] sm:$0xff]  ;;  %v1473_v27 = vld [vmem:[%s2683_s1 + $0x78] sm:$0xff]  ;;  %v104_v32 = vld [vmem:[%s2683_s1 + $0x28] sm:$0xff] }
   0x7   :  { %1763 = vmatprep.subr.mxu1 %v107_v20  ;;  %1742 = vmatprep.subr.mxu0 %v1475_v21  ;;  %v62_v28 = vrot.slane %v54_v12, %v61_v25  ;;  %v69_v29 = vrot.slane %v55_v13, %v61_v25  ;;  %v79_v30 = vrot.slane %v71_v16, %v61_v25  ;;  %v1472_v34 = vld [vmem:[%s2683_s1 + $0x70] sm:$0xff] }
   0x8   :  { %1764 = vmatpush3.msra.mxu1 %v107_v20  ;;  %1743 = vmatpush3.msra.mxu0 %v1475_v21  ;;  %v86_v31 = vrot.slane %v72_v19, %v61_v25 }
   0x9   :  { %1765 = vmatprep.subr.mxu1 %v106_v22  ;;  %1744 = vmatprep.subr.mxu0 %v1474_v23  ;;  %v70_v33 = vcombine.low %v62_v28, %v69_v29 }
   0xa   :  { %1766 = vmatpush3.msra.mxu1 %v106_v22  ;;  %1745 = vmatpush3.msra.mxu0 %v1474_v23 }
   0xb   :  { %1767 = vmatprep.subr.mxu1 %v105_v26  ;;  %1746 = vmatprep.subr.mxu0 %v1473_v27 }
   0xc   :  { %14 = vsyncpa [#allocation4], 0  ;;  %1768 = vmatpush3.msra.mxu1 %v105_v26  ;;  %1747 = vmatpush3.msra.mxu0 %v1473_v27  ;;  %v103_v35 = vld [vmem:[%s2683_s1 + $0x20] sm:$0xff]  ;;  %s2068_s27 = smov 8   ;;  %v87_v36 = vcombine.low %v79_v30, %v86_v31  ;;  %v1471_v37 = vld [vmem:[%s2683_s1 + $0x68] sm:$0xff]  ;;  %vm94_vm2 = vcmask 588864  }
   0xd   :  { %88 = vrot.lane.b32.xlu0 %v70_v33, %s2068_s27  ;;  %1769 = vmatprep.subr.mxu1 %v104_v32  ;;  %v102_v38 = vld [vmem:[%s2683_s1 + $0x18] sm:$0xff]  ;;  %v1470_v39 = vld [vmem:[%s2683_s1 + $0x60] sm:$0xff]  ;;  %v101_v40 = vld [vmem:[%s2683_s1 + $0x10] sm:$0xff]  ;;  %vm2069_vm3 = vmmov 0   ;;  %vm714_vm4 = vcmask 523264   ;;  %vm1377_vm5 = vcmask 261120  }
   0xe   :  { %1748 = vmatprep.subr.mxu0 %v1472_v34  ;;  %1770 = vmatpush3.msra.mxu1 %v104_v32  ;;  %v1469_v41 = vld [vmem:[%s2683_s1 + $0x58] sm:$0xff]  ;;  %v100_v42 = vld [vmem:[%s2683_s1 + $0x8] sm:$0xff]  ;;  %v1468_v43 = vld [vmem:[%s2683_s1 + $0x50] sm:$0xff]  ;;  %s2070_s23 = smov [#allocation3]   ;;  %vm1452_vm6 = vcmask 254976  }
   0xf   :  { %1749 = vmatpush3.msra.mxu0 %v1472_v34  ;;  %1771 = vmatprep.subr.mxu1 %v103_v35  ;;  %v99_v44 = vld [vmem:[%s2683_s1] sm:$0xff]  ;;  %v1491_v45 = vld [vmem:[%s2683_s1 + $0xe8] sm:$0xff]  ;;  %v1489_v54 = vld [vmem:[%s2683_s1 + $0xd8] sm:$0xff]  ;;  %s1460_s24 = sshll.u32 %s2070_s23, 4  ;;  %s1461_s24 = int_to_ptr.vmem [resolvable:$true] %s1460_s24 }
  0x10   :  { %1750 = vmatprep.subr.mxu0 %v1471_v37  ;;  %1772 = vmatpush3.msra.mxu1 %v103_v35  ;;  %v1490_v50 = vld [vmem:[%s2683_s1 + $0xe0] sm:$0xff]  ;;  %v1488_v55 = vld [vmem:[%s2683_s1 + $0xd0] sm:$0xff]  ;;  %v1487_v56 = vld [vmem:[%s2683_s1 + $0xc8] sm:$0xff]  ;;  %p2049_p1 = scmp.lt.s32.totalorder %s1461_s24, %s1461_s24 }
  0x11   :  { %90 = vrot.lane.b32.xlu0 %v87_v36, %s2068_s27  ;;  %1751 = vmatpush3.msra.mxu0 %v1471_v37  ;;  %v1486_v57 = vld [vmem:[%s2683_s1 + $0xc0] sm:$0xff]  ;;  %v1485_v58 = vld [vmem:[%s2683_s1 + $0xb8] sm:$0xff]  ;;  %v1484_v59 = vld [vmem:[%s2683_s1 + $0xb0] sm:$0xff] }
  0x12   :  { %1773 = vmatprep.subr.mxu1 %v102_v38  ;;  %1752 = vmatprep.subr.mxu0 %v1470_v39  ;;  %v1483_v60 = vld [vmem:[%s2683_s1 + $0xa8] sm:$0xff]  ;;  %v1482_v61 = vld [vmem:[%s2683_s1 + $0xa0] sm:$0xff]  ;;  %v1504_v63 = vld [vmem:[%s2685_s3 + $0x98] sm:$0xff] }
  0x13   :  { %1774 = vmatpush3.msra.mxu1 %v102_v38  ;;  %1753 = vmatpush3.msra.mxu0 %v1470_v39  ;;  %v412_v0 = vld [vmem:[%s2685_s3 + $0x48] sm:$0xff]  ;;  %v1503_v1 = vld [vmem:[%s2685_s3 + $0x90] sm:$0xff]  ;;  %v411_v2 = vld [vmem:[%s2685_s3 + $0x40] sm:$0xff] }
  0x14   :  { %1775 = vmatprep.subr.mxu1 %v101_v40  ;;  %1754 = vmatprep.subr.mxu0 %v1469_v41  ;;  %v1502_v3 = vld [vmem:[%s2685_s3 + $0x88] sm:$0xff]  ;;  %v410_v4 = vld [vmem:[%s2685_s3 + $0x38] sm:$0xff]  ;;  %v1501_v5 = vld [vmem:[%s2685_s3 + $0x80] sm:$0xff] }
  0x15   :  { %1776 = vmatpush3.msra.mxu1 %v101_v40  ;;  %1755 = vmatpush3.msra.mxu0 %v1469_v41  ;;  %v409_v6 = vld [vmem:[%s2685_s3 + $0x30] sm:$0xff]  ;;  %v1500_v7 = vld [vmem:[%s2685_s3 + $0x78] sm:$0xff]  ;;  %v408_v10 = vld [vmem:[%s2685_s3 + $0x28] sm:$0xff] }
  0x16   :  { %1777 = vmatprep.subr.mxu1 %v100_v42  ;;  %1756 = vmatprep.subr.mxu0 %v1468_v43  ;;  %v1499_v11 = vld [vmem:[%s2685_s3 + $0x70] sm:$0xff]  ;;  %v407_v12 = vld [vmem:[%s2685_s3 + $0x20] sm:$0xff]  ;;  %v1498_v13 = vld [vmem:[%s2685_s3 + $0x68] sm:$0xff] }
  0x17   :  { %1778 = vmatpush3.msra.mxu1 %v100_v42  ;;  %1757 = vmatpush3.msra.mxu0 %v1468_v43  ;;  %v406_v16 = vld [vmem:[%s2685_s3 + $0x18] sm:$0xff]  ;;  %v1497_v18 = vld [vmem:[%s2685_s3 + $0x60] sm:$0xff]  ;;  %v405_v19 = vld [vmem:[%s2685_s3 + $0x10] sm:$0xff] }
  0x18   :  { %1779 = vmatprep.subr.mxu1 %v99_v44  ;;  %1784 = vmatprep.subr.mxu0 %v1491_v45  ;;  %v1496_v20 = vld [vmem:[%s2685_s3 + $0x58] sm:$0xff]  ;;  %v1494_v26 = vld [vmem:[%s2684_s2] ss:$0 sm:$0xff]  ;;  %v404_v28 = vld [vmem:[%s2685_s3 + $0x8] sm:$0xff] }
  0x19   :  { %1780 = vmatpush3.msra.mxu1 %v99_v44  ;;  %v1495_v29 = vld [vmem:[%s2685_s3 + $0x50] sm:$0xff]  ;;  %v403_v30 = vld [vmem:[%s2685_s3] sm:$0xff]  ;;  %v1518_v31 = vld [vmem:[%s2685_s3 + $0xe8] sm:$0xff] }
  0x1a   :  { %1807 = vmatprep.subr.mxu1 %v1504_v63  ;;  %v1517_v40 = vld [vmem:[%s2685_s3 + $0xe0] sm:$0xff]  ;;  %v1516_v44 = vld [vmem:[%s2685_s3 + $0xd8] sm:$0xff] }
  0x7f   :  { %v89_v46 = vpop.permute.xlu0 %88 }
  0x80   :  { %95 = vst.msk [vmem:[#allocation2 + $0x2] sm:$0xff] %vm94_vm2, %v89_v46  ;;  %v1514_v46 = vld [vmem:[%s2685_s3 + $0xc8] sm:$0xff] }
  0x83   :  { %v91_v47 = vpop.permute.xlu0 %90 }
  0x84   :  { %96 = vst.msk [vmem:[#allocation2 + $0xa] sm:$0xff] %vm94_vm2, %v91_v47  ;;  %v1513_v47 = vld [vmem:[%s2685_s3 + $0xc0] sm:$0xff] }
  0x87   :  { %v109_v48 = vld [vmem:[#allocation2 + $0x2] sm:$0xff] }
  0x88   :  { %v97_v49 = vld [vmem:[#allocation2] sm:$0xff]  ;;  %1758 = vmatprep.mubr.msk.f32.mxu0 %vm33_vm0, %v109_v48  ;;  %v1512_v48 = vld [vmem:[%s2685_s3 + $0xb8] sm:$0xff] }
  0x89   :  { %1781 = vmatprep.mubr.msk.f32.mxu1 %vm33_vm0, %v97_v49  ;;  %v1511_v49 = vld [vmem:[%s2685_s3 + $0xb0] sm:$0xff] }
  0x8b   :  { %v110_v51 = vld [vmem:[#allocation2 + $0xa] sm:$0xff] }
  0x8c   :  { %v98_v52 = vld [vmem:[#allocation2 + $0x8] sm:$0xff]  ;;  %1759 = vmatmul.mubr.msk.f32.vlgmr.msra.gmra.mxu0 %vm33_vm0, %v110_v51  ;;  %v1509_v51 = vld [vmem:[%s2685_s3 + $0xa0] sm:$0xff] }
  0x8d   :  { %v284_v53 = vld [vmem:[#allocation2 + $0x4] sm:$0xff]  ;;  %1782 = vmatmul.mubr.msk.f32.vlgmr.msra.gmra.mxu1 %vm33_vm0, %v98_v52  ;;  %1785 = vmatpush3.msra.mxu0 %v1491_v45  ;;  %v285_v62 = vld [vmem:[#allocation2 + $0xc] sm:$0xff] }
  0x8e   :  { %1804 = vmatprep.mubr.msk.f32.mxu0 %vm33_vm0, %v284_v53  ;;  %1786 = vmatprep.subr.mxu0 %v1490_v50  ;;  %v1515_v45 = vld [vmem:[%s2685_s3 + $0xd0] sm:$0xff]  ;;  %v702_v53 = vld [vmem:[%s2687_s5 + $0x38] sm:$0xff] }
  0x8f   :  { %1787 = vmatpush3.msra.mxu0 %v1490_v50  ;;  %1808 = vmatpush3.msra.mxu1 %v1504_v63  ;;  %v1510_v50 = vld [vmem:[%s2685_s3 + $0xa8] sm:$0xff]  ;;  %v697_v63 = vld [vmem:[%s2687_s5 + $0x10] sm:$0xff] }
  0x90   :  { %1788 = vmatprep.subr.mxu0 %v1489_v54  ;;  %1809 = vmatprep.subr.mxu1 %v1503_v1 }
  0x91   :  { %1789 = vmatpush3.msra.mxu0 %v1489_v54  ;;  %1810 = vmatpush3.msra.mxu1 %v1503_v1  ;;  %v1529_v54 = vld [vmem:[%s2687_s5 + $0x78] sm:$0xff]  ;;  %v696_v1 = vld [vmem:[%s2687_s5 + $0x8] sm:$0xff] }
  0x92   :  { %1790 = vmatprep.subr.mxu0 %v1488_v55  ;;  %1811 = vmatprep.subr.mxu1 %v1502_v3 }
  0x93   :  { %1791 = vmatpush3.msra.mxu0 %v1488_v55  ;;  %1812 = vmatpush3.msra.mxu1 %v1502_v3  ;;  %v701_v55 = vld [vmem:[%s2687_s5 + $0x30] sm:$0xff]  ;;  %v695_v3 = vld [vmem:[%s2687_s5] sm:$0xff] }
  0x94   :  { %1792 = vmatprep.subr.mxu0 %v1487_v56  ;;  %1813 = vmatprep.subr.mxu1 %v1501_v5 }
  0x95   :  { %1793 = vmatpush3.msra.mxu0 %v1487_v56  ;;  %1814 = vmatpush3.msra.mxu1 %v1501_v5  ;;  %v1528_v56 = vld [vmem:[%s2687_s5 + $0x70] sm:$0xff] }
  0x96   :  { %1794 = vmatprep.subr.mxu0 %v1486_v57  ;;  %1815 = vmatprep.subr.mxu1 %v1500_v7 }
  0x97   :  { %1795 = vmatpush3.msra.mxu0 %v1486_v57  ;;  %1816 = vmatpush3.msra.mxu1 %v1500_v7  ;;  %v700_v57 = vld [vmem:[%s2687_s5 + $0x28] sm:$0xff] }
  0x98   :  { %1796 = vmatprep.subr.mxu0 %v1485_v58  ;;  %1817 = vmatprep.subr.mxu1 %v1499_v11 }
  0x99   :  { %1797 = vmatpush3.msra.mxu0 %v1485_v58  ;;  %1818 = vmatpush3.msra.mxu1 %v1499_v11  ;;  %v1527_v58 = vld [vmem:[%s2687_s5 + $0x68] sm:$0xff] }
  0x9a   :  { %1798 = vmatprep.subr.mxu0 %v1484_v59  ;;  %1819 = vmatprep.subr.mxu1 %v1498_v13 }
  0x9b   :  { %1799 = vmatpush3.msra.mxu0 %v1484_v59  ;;  %1820 = vmatpush3.msra.mxu1 %v1498_v13  ;;  %v699_v59 = vld [vmem:[%s2687_s5 + $0x20] sm:$0xff] }
  0x9c   :  { %1800 = vmatprep.subr.mxu0 %v1483_v60  ;;  %1821 = vmatprep.subr.mxu1 %v1497_v18  ;;  %v2432_v13 = vld [vmem:[%s2686_s4] ss:$0 sm:$0xff] }
  0x9d   :  { %1801 = vmatpush3.msra.mxu0 %v1483_v60  ;;  %1822 = vmatpush3.msra.mxu1 %v1497_v18  ;;  %v1526_v60 = vld [vmem:[%s2687_s5 + $0x60] sm:$0xff]  ;;  %v1539_v18 = vld [vmem:[%s2687_s5 + $0xb8] sm:$0xff] }
  0x9e   :  { %1802 = vmatprep.subr.mxu0 %v1482_v61  ;;  %1823 = vmatprep.subr.mxu1 %v1496_v20 }
  0x9f   :  { %1803 = vmatpush3.msra.mxu0 %v1482_v61  ;;  %1824 = vmatpush3.msra.mxu1 %v1496_v20  ;;  %v698_v61 = vld [vmem:[%s2687_s5 + $0x18] sm:$0xff]  ;;  %v1538_v20 = vld [vmem:[%s2687_s5 + $0xb0] sm:$0xff] }
  0xa0   :  { %1805 = vmatmul.mubr.msk.f32.vlgmr.msra.gmra.mxu0 %vm33_vm0, %v285_v62  ;;  %1830 = vmatprep.subr.mxu0 %v412_v0  ;;  %v1525_v62 = vld [vmem:[%s2687_s5 + $0x58] sm:$0xff] }
  0xa1   :  { %1831 = vmatpush3.msra.mxu0 %v412_v0  ;;  %1825 = vmatprep.subr.mxu1 %v1495_v29  ;;  %v1524_v0 = vld [vmem:[%s2687_s5 + $0x50] sm:$0xff] }
  0xa2   :  { %1832 = vmatprep.subr.mxu0 %v411_v2  ;;  %1826 = vmatpush3.msra.mxu1 %v1495_v29  ;;  %v1534_v29 = vld [vmem:[%s2687_s5 + $0x90] sm:$0xff] }
  0xa3   :  { %1833 = vmatpush3.msra.mxu0 %v411_v2  ;;  %1853 = vmatprep.subr.mxu1 %v1518_v31  ;;  %v1523_v2 = vld [vmem:[%s2687_s5 + $0x48] sm:$0xff] }
  0xa4   :  { %1834 = vmatprep.subr.mxu0 %v410_v4 }
  0xa5   :  { %1835 = vmatpush3.msra.mxu0 %v410_v4  ;;  %v1522_v4 = vld [vmem:[%s2687_s5 + $0x40] sm:$0xff] }
  0xa6   :  { %1836 = vmatprep.subr.mxu0 %v409_v6 }
  0xa7   :  { %1837 = vmatpush3.msra.mxu0 %v409_v6 }
  0xa8   :  { %1838 = vmatprep.subr.mxu0 %v408_v10 }
  0xa9   :  { %1839 = vmatpush3.msra.mxu0 %v408_v10 }
  0xaa   :  { %1840 = vmatprep.subr.mxu0 %v407_v12 }
  0xab   :  { %1841 = vmatpush3.msra.mxu0 %v407_v12 }
  0xac   :  { %1842 = vmatprep.subr.mxu0 %v406_v16 }
  0xad   :  { %1843 = vmatpush3.msra.mxu0 %v406_v16  ;;  %v1548_v16 = vld [vmem:[%s2687_s5 + $0xf8] sm:$0xff] }
  0xae   :  { %1844 = vmatprep.subr.mxu0 %v405_v19 }
  0xaf   :  { %1845 = vmatpush3.msra.mxu0 %v405_v19  ;;  %v1547_v19 = vld [vmem:[%s2687_s5 + $0xf0] sm:$0xff] }
  0xb0   :  { %1846 = vmatprep.subr.mxu0 %v404_v28 }
  0xb1   :  { %1847 = vmatpush3.msra.mxu0 %v404_v28  ;;  %v1543_v28 = vld [vmem:[%s2687_s5 + $0xd0] sm:$0xff] }
  0xb2   :  { %1848 = vmatprep.subr.mxu0 %v403_v30 }
  0xb3   :  { %1849 = vmatpush3.msra.mxu0 %v403_v30  ;;  %v1542_v30 = vld [vmem:[%s2687_s5 + $0xc8] sm:$0xff] }
  0xb4   :  { %1876 = vmatprep.subr.mxu0 %v2067_v24 }
 0x14c   :  { %v1760_v8 = vpop.f32.mrf.mxu0 }
 0x14d   :  { %v1783_v9 = vpop.f32.mrf.mxu1 }
 0x14e   :  { %v194_v14 = vpop.f32.mrf.mxu0  ;;  %v281_v21 = vadd.f32 %v1783_v9, %v1760_v8 }
 0x14f   :  { %v275_v15 = vpop.f32.mrf.mxu1 }
 0x150   :  { %v276_v22 = vadd.f32 %v275_v15, %v194_v14 }
 0x160   :  { %v1806_v17 = vpop.f32.mrf.mxu0 }
 0x161   :  { %v379_v25 = vadd.f32 %v1806_v17, %v281_v21  ;;  %v1546_v21 = vld [vmem:[%s2687_s5 + $0xe8] sm:$0xff] }
 0x162   :  { %v369_v23 = vpop.f32.mrf.mxu0 }
 0x163   :  { %v378_v27 = vadd.f32 %v369_v23, %v276_v22  ;;  %v388_v33 = vadd.f32 %v1494_v26, %v379_v25  ;;  %v1537_v22 = vld [vmem:[%s2687_s5 + $0xa8] sm:$0xff]  ;;  %v1545_v23 = vld [vmem:[%s2687_s5 + $0xe0] sm:$0xff] }
 0x164   :  { %v1536_v25 = vld [vmem:[%s2687_s5 + $0xa0] sm:$0xff] }
 0x165   :  { %v387_v32 = vadd.f32 %v1494_v26, %v378_v27  ;;  %v390_v35 = vmax.f32 %v388_v33, 0.0  ;;  %v1544_v26 = vld [vmem:[%s2687_s5 + $0xd8] sm:$0xff] }
 0x166   :  { %v1535_v27 = vld [vmem:[%s2687_s5 + $0x98] sm:$0xff] }
 0x167   :  { %v389_v34 = vmax.f32 %v387_v32, 0.0  ;;  %v1541_v32 = vld [vmem:[%s2687_s5 + $0xc0] sm:$0xff] }
 0x169   :  { %393 = vrot.lane.b32.xlu1 %v389_v34, %s2068_s27  ;;  %v1532_v34 = vld [vmem:[%s2687_s5 + $0x80] sm:$0xff] }
 0x16d   :  { %395 = vrot.lane.b32.xlu1 %v390_v35, %s2068_s27  ;;  %v1566_v35 = vld [vmem:[%s2687_s5 + $0x178] sm:$0xff] }
 0x1db   :  { %v394_v36 = vpop.permute.xlu1 %393 }
 0x1dc   :  { %399 = vst.msk [vmem:[#allocation2 + $0x2] sm:$0xff] %vm94_vm2, %v394_v36 }
 0x1df   :  { %v396_v37 = vpop.permute.xlu1 %395 }
 0x1e0   :  { %400 = vst.msk [vmem:[#allocation2 + $0xa] sm:$0xff] %vm94_vm2, %v396_v37  ;;  %v1557_v37 = vld [vmem:[%s2687_s5 + $0x138] sm:$0xff] }
 0x1e3   :  { %v413_v38 = vld [vmem:[#allocation2 + $0x2] sm:$0xff] }
 0x1e4   :  { %v401_v39 = vld [vmem:[#allocation2] sm:$0xff]  ;;  %1827 = vmatprep.mubr.msk.f32.mxu1 %vm33_vm0, %v413_v38 }
 0x1e5   :  { %1850 = vmatprep.mubr.msk.f32.mxu0 %vm33_vm0, %v401_v39  ;;  %v1565_v39 = vld [vmem:[%s2687_s5 + $0x170] sm:$0xff] }
 0x1e7   :  { %v414_v41 = vld [vmem:[#allocation2 + $0xa] sm:$0xff] }
 0x1e8   :  { %v402_v42 = vld [vmem:[#allocation2 + $0x8] sm:$0xff]  ;;  %1828 = vmatmul.mubr.msk.f32.vlgmr.msra.gmra.mxu1 %vm33_vm0, %v414_v41 }
 0x1e9   :  { %v588_v43 = vld [vmem:[#allocation2 + $0x4] sm:$0xff]  ;;  %1851 = vmatmul.mubr.msk.f32.vlgmr.msra.gmra.mxu0 %vm33_vm0, %v402_v42  ;;  %1854 = vmatpush3.msra.mxu1 %v1518_v31  ;;  %v589_v52 = vld [vmem:[#allocation2 + $0xc] sm:$0xff] }
 0x1ea   :  { %1873 = vmatprep.mubr.msk.f32.mxu1 %vm33_vm0, %v588_v43  ;;  %1855 = vmatprep.subr.mxu1 %v1517_v40  ;;  %v1533_v31 = vld [vmem:[%s2687_s5 + $0x88] sm:$0xff] }
 0x1eb   :  { %1856 = vmatpush3.msra.mxu1 %v1517_v40  ;;  %1877 = vmatpush3.msra.mxu0 %v1529_v54  ;;  %v1556_v40 = vld [vmem:[%s2687_s5 + $0x130] sm:$0xff]  ;;  %v1564_v42 = vld [vmem:[%s2687_s5 + $0x168] sm:$0xff]  ;;  %v1559_v54 = vld [vmem:[%s2687_s5 + $0x140] sm:$0xff] }
 0x1ec   :  { %1857 = vmatprep.subr.mxu1 %v1516_v44  ;;  %1878 = vmatprep.subr.mxu0 %v2067_v24  ;;  %v1555_v43 = vld [vmem:[%s2687_s5 + $0x128] sm:$0xff] }
 0x1ed   :  { %1858 = vmatpush3.msra.mxu1 %v1516_v44  ;;  %1879 = vmatpush3.msra.mxu0 %v1528_v56  ;;  %v1563_v44 = vld [vmem:[%s2687_s5 + $0x160] sm:$0xff] }
 0x1ee   :  { %1859 = vmatprep.subr.mxu1 %v1515_v45  ;;  %1880 = vmatprep.subr.mxu0 %v2067_v24  ;;  %v1550_v56 = vld [vmem:[%s2687_s5 + $0x100] sm:$0xff] }
 0x1ef   :  { %1860 = vmatpush3.msra.mxu1 %v1515_v45  ;;  %1881 = vmatpush3.msra.mxu0 %v1527_v58  ;;  %v1554_v45 = vld [vmem:[%s2687_s5 + $0x120] sm:$0xff]  ;;  %v1575_v58 = vld [vmem:[%s2687_s5 + $0x1b8] sm:$0xff] }
 0x1f0   :  { %1861 = vmatprep.subr.mxu1 %v1514_v46  ;;  %1882 = vmatprep.subr.mxu0 %v2067_v24 }
 0x1f1   :  { %1862 = vmatpush3.msra.mxu1 %v1514_v46  ;;  %1883 = vmatpush3.msra.mxu0 %v1526_v60  ;;  %v1574_v60 = vld [vmem:[%s2687_s5 + $0x1b0] sm:$0xff] }
 0x1f2   :  { %1863 = vmatprep.subr.mxu1 %v1513_v47  ;;  %1884 = vmatprep.subr.mxu0 %v2067_v24 }
 0x1f3   :  { %1864 = vmatpush3.msra.mxu1 %v1513_v47  ;;  %1885 = vmatpush3.msra.mxu0 %v1525_v62  ;;  %v1562_v47 = vld [vmem:[%s2687_s5 + $0x158] sm:$0xff]  ;;  %v1573_v62 = vld [vmem:[%s2687_s5 + $0x1a8] sm:$0xff] }
 0x1f4   :  { %1865 = vmatprep.subr.mxu1 %v1512_v48  ;;  %1886 = vmatprep.subr.mxu0 %v2067_v24 }
 0x1f5   :  { %1866 = vmatpush3.msra.mxu1 %v1512_v48  ;;  %1887 = vmatpush3.msra.mxu0 %v1524_v0  ;;  %v1553_v48 = vld [vmem:[%s2687_s5 + $0x118] sm:$0xff]  ;;  %v1572_v0 = vld [vmem:[%s2687_s5 + $0x1a0] sm:$0xff] }
 0x1f6   :  { %1867 = vmatprep.subr.mxu1 %v1511_v49  ;;  %1888 = vmatprep.subr.mxu0 %v2067_v24 }
 0x1f7   :  { %1868 = vmatpush3.msra.mxu1 %v1511_v49  ;;  %1889 = vmatpush3.msra.mxu0 %v1523_v2  ;;  %v1561_v49 = vld [vmem:[%s2687_s5 + $0x150] sm:$0xff]  ;;  %v1571_v2 = vld [vmem:[%s2687_s5 + $0x198] sm:$0xff] }
 0x1f8   :  { %1869 = vmatprep.subr.mxu1 %v1510_v50  ;;  %1890 = vmatprep.subr.mxu0 %v2067_v24 }
 0x1f9   :  { %1870 = vmatpush3.msra.mxu1 %v1510_v50  ;;  %1891 = vmatpush3.msra.mxu0 %v1522_v4  ;;  %v1552_v50 = vld [vmem:[%s2687_s5 + $0x110] sm:$0xff] }
 0x1fa   :  { %1871 = vmatprep.subr.mxu1 %v1509_v51  ;;  %1892 = vmatprep.mubr.msk.f32.mxu0 %vm2069_vm3, %v2067_v24  ;;  %v1570_v4 = vld [vmem:[%s2687_s5 + $0x190] sm:$0xff] }
 0x1fb   :  { %1872 = vmatpush3.msra.mxu1 %v1509_v51  ;;  %1914 = vmatprep.subr.mxu0 %v2067_v24 }
 0x1fc   :  { %1874 = vmatmul.mubr.msk.f32.vlgmr.msra.gmra.mxu1 %vm33_vm0, %v589_v52  ;;  %1895 = vmatprep.subr.mxu1 %v2067_v24  ;;  %v1560_v52 = vld [vmem:[%s2687_s5 + $0x148] sm:$0xff] }
 0x1fd   :  { %1896 = vmatpush3.msra.mxu1 %v702_v53  ;;  %1911 = vmatprep.mubr.msk.f32.mxu1 %vm2069_vm3, %v2067_v24  ;;  %v1551_v53 = vld [vmem:[%s2687_s5 + $0x108] sm:$0xff] }
 0x1fe   :  { %1897 = vmatprep.subr.mxu1 %v2067_v24 }
 0x1ff   :  { %1898 = vmatpush3.msra.mxu1 %v701_v55 }
 0x200   :  { %1899 = vmatprep.subr.mxu1 %v2067_v24 }
 0x201   :  { %1900 = vmatpush3.msra.mxu1 %v700_v57  ;;  %v1584_v57 = vld [vmem:[%s2687_s5 + $0x1f8] sm:$0xff] }
 0x202   :  { %1901 = vmatprep.subr.mxu1 %v2067_v24 }
 0x203   :  { %1902 = vmatpush3.msra.mxu1 %v699_v59  ;;  %v1583_v59 = vld [vmem:[%s2687_s5 + $0x1f0] sm:$0xff] }
 0x204   :  { %1903 = vmatprep.subr.mxu1 %v2067_v24 }
 0x205   :  { %1904 = vmatpush3.msra.mxu1 %v698_v61  ;;  %v1582_v61 = vld [vmem:[%s2687_s5 + $0x1e8] sm:$0xff] }
 0x206   :  { %1905 = vmatprep.subr.mxu1 %v2067_v24 }
 0x207   :  { %1906 = vmatpush3.msra.mxu1 %v697_v63  ;;  %v1581_v63 = vld [vmem:[%s2687_s5 + $0x1e0] sm:$0xff] }
 0x208   :  { %1907 = vmatprep.subr.mxu1 %v2067_v24 }
 0x209   :  { %1908 = vmatpush3.msra.mxu1 %v696_v1  ;;  %v1580_v1 = vld [vmem:[%s2687_s5 + $0x1d8] sm:$0xff] }
 0x20a   :  { %1909 = vmatprep.subr.mxu1 %v2067_v24 }
 0x20b   :  { %1910 = vmatpush3.msra.mxu1 %v695_v3  ;;  %v1579_v3 = vld [vmem:[%s2687_s5 + $0x1d0] sm:$0xff] }
 0x20c   :  { %1933 = vmatprep.subr.mxu1 %v2067_v24 }
 0x2a8   :  { %v2423_v5 = vpop.f32.mrf.mxu1 }
 0x2a9   :  { %v2425_v6 = vpop.f32.mrf.mxu0 }
 0x2aa   :  { %v498_v7 = vpop.f32.mrf.mxu1  ;;  %v585_v38 = vadd.f32 %v2425_v6, %v2423_v5  ;;  %v1578_v5 = vld [vmem:[%s2687_s5 + $0x1c8] sm:$0xff] }
 0x2ab   :  { %v579_v8 = vpop.f32.mrf.mxu0  ;;  %v1569_v6 = vld [vmem:[%s2687_s5 + $0x188] sm:$0xff] }
 0x2ac   :  { %v580_v10 = vadd.f32 %v579_v8, %v498_v7  ;;  %v1577_v7 = vld [vmem:[%s2687_s5 + $0x1c0] sm:$0xff] }
 0x2bc   :  { %v2427_v9 = vpop.f32.mrf.mxu1 }
 0x2bd   :  { %v683_v41 = vadd.f32 %v2427_v9, %v585_v38  ;;  %v1568_v9 = vld [vmem:[%s2687_s5 + $0x180] sm:$0xff] }
 0x2be   :  { %v673_v11 = vpop.f32.mrf.mxu1 }
 0x2bf   :  { %v682_v12 = vadd.f32 %v673_v11, %v580_v10  ;;  %v692_v46 = vadd.f32 %v2432_v13, %v683_v41  ;;  %v1369_v11 = vld [vmem:[%s2689_s7 + $0x18] sm:$0xff]  ;;  %v1587_v41 = vld [vmem:[%s2690_s8] ss:$0 sm:$0xff] }
 0x2c1   :  { %v691_v14 = vadd.f32 %v2432_v13, %v682_v12  ;;  %v2555_v51 = vmax.f32 %v692_v46, 0.0  ;;  %v1368_v12 = vld [vmem:[%s2689_s7 + $0x10] sm:$0xff]  ;;  %v1367_v13 = vld [vmem:[%s2689_s7 + $0x8] sm:$0xff] }
 0x2c3   :  { %v693_v15 = vmax.f32 %v691_v14, 0.0  ;;  %v1117_v55 = vrot.slane %v2555_v51, 2  ;;  %v1283_v8 = vrot.slane %v2555_v51, 6  ;;  %v1200_v10 = vrot.slane %v2555_v51, 4  ;;  %v1366_v14 = vld [vmem:[%s2689_s7] sm:$0xff] }
 0x2c5   :  { %v713_v17 = vrot.slane %v693_v15, 2  ;;  %1912 = vmatmul.mubr.msk.f32.vlgmr.msra.gmra.mxu1 %vm714_vm4, %v693_v15  ;;  %v951_v33 = vrot.slane %v693_v15, 6  ;;  %v868_v36 = vrot.slane %v693_v15, 4 }
 0x2c6   :  { %1934 = vmatpush3.msra.mxu1 %v1548_v16  ;;  %1949 = vmatprep.mubr.msk.f32.mxu1 %vm2069_vm3, %v2067_v24 }
 0x2c7   :  { %1935 = vmatprep.subr.mxu1 %v2067_v24  ;;  %1893 = vmatmul.mubr.msk.f32.vlgmr.msra.gmra.mxu0 %vm714_vm4, %v713_v17 }
 0x2c8   :  { %1915 = vmatpush3.msra.mxu0 %v1539_v18  ;;  %1936 = vmatpush3.msra.mxu1 %v1547_v19 }
 0x2c9   :  { %1916 = vmatprep.subr.mxu0 %v2067_v24  ;;  %1937 = vmatprep.subr.mxu1 %v2067_v24 }
 0x2ca   :  { %1917 = vmatpush3.msra.mxu0 %v1538_v20  ;;  %1938 = vmatpush3.msra.mxu1 %v1546_v21 }
 0x2cb   :  { %1918 = vmatprep.subr.mxu0 %v2067_v24  ;;  %1939 = vmatprep.subr.mxu1 %v2067_v24 }
 0x2cc   :  { %1919 = vmatpush3.msra.mxu0 %v1537_v22  ;;  %1940 = vmatpush3.msra.mxu1 %v1545_v23 }
 0x2cd   :  { %1920 = vmatprep.subr.mxu0 %v2067_v24  ;;  %1941 = vmatprep.subr.mxu1 %v2067_v24 }
 0x2ce   :  { %1921 = vmatpush3.msra.mxu0 %v1536_v25  ;;  %1942 = vmatpush3.msra.mxu1 %v1544_v26 }
 0x2cf   :  { %1922 = vmatprep.subr.mxu0 %v2067_v24  ;;  %1943 = vmatprep.subr.mxu1 %v2067_v24 }
 0x2d0   :  { %1923 = vmatpush3.msra.mxu0 %v1535_v27  ;;  %1944 = vmatpush3.msra.mxu1 %v1543_v28 }
 0x2d1   :  { %1924 = vmatprep.subr.mxu0 %v2067_v24  ;;  %1945 = vmatprep.subr.mxu1 %v2067_v24 }
 0x2d2   :  { %1925 = vmatpush3.msra.mxu0 %v1534_v29  ;;  %1946 = vmatpush3.msra.mxu1 %v1542_v30 }
 0x2d3   :  { %1926 = vmatprep.subr.mxu0 %v2067_v24  ;;  %1947 = vmatprep.subr.mxu1 %v2067_v24 }
 0x2d4   :  { %1927 = vmatpush3.msra.mxu0 %v1533_v31  ;;  %1948 = vmatpush3.msra.mxu1 %v1541_v32 }
 0x2d5   :  { %1928 = vmatprep.subr.mxu0 %v2067_v24  ;;  %1950 = vmatmul.mubr.msk.f32.vlgmr.msra.gmra.mxu1 %vm714_vm4, %v951_v33 }
 0x2d6   :  { %1971 = vmatprep.subr.mxu1 %v2067_v24  ;;  %1929 = vmatpush3.msra.mxu0 %v1532_v34 }
 0x2d7   :  { %1930 = vmatprep.mubr.msk.f32.mxu0 %vm2069_vm3, %v2067_v24  ;;  %1972 = vmatpush3.msra.mxu1 %v1566_v35 }
 0x2d8   :  { %1931 = vmatmul.mubr.msk.f32.vlgmr.msra.gmra.mxu0 %vm714_vm4, %v868_v36  ;;  %1952 = vmatprep.subr.mxu0 %v2067_v24  ;;  %v1586_v36 = vld [vmem:[%s2688_s6] ss:$0 sm:$0xff]  ;;  %s2044_s6 = scalar_lea.vmem %s1461_s24, 32 }
 0x2d9   :  { %1973 = vmatprep.subr.mxu1 %v2067_v24  ;;  %1953 = vmatpush3.msra.mxu0 %v1557_v37  ;;  %p2045_p0 = scmp.ne.s32.totalorder %s1461_s24, %s2044_s6  ;;  %p2050_p2 = scmp.lt.s32.totalorder %s2044_s6, %s2044_s6 }
 0x2da   :  { %1974 = vmatpush3.msra.mxu1 %v1565_v39  ;;  %1954 = vmatprep.subr.mxu0 %v2067_v24 }
 0x2db   :  { %1975 = vmatprep.subr.mxu1 %v2067_v24  ;;  %1955 = vmatpush3.msra.mxu0 %v1556_v40  ;;  %p2051_p3 = por %p2050_p2, %p2049_p1 }
 0x2dc   :  { %1976 = vmatpush3.msra.mxu1 %v1564_v42  ;;  %1956 = vmatprep.subr.mxu0 %v2067_v24 }
 0x2dd   :  { %1977 = vmatprep.subr.mxu1 %v2067_v24  ;;  %1957 = vmatpush3.msra.mxu0 %v1555_v43  ;;  %p2052_p4 = pnand %p2051_p3, %p2045_p0 }
 0x2de   :  { %1978 = vmatpush3.msra.mxu1 %v1563_v44  ;;  %1958 = vmatprep.subr.mxu0 %v2067_v24 }
 0x2df   :  { %1979 = vmatprep.subr.mxu1 %v2067_v24  ;;  %1959 = vmatpush3.msra.mxu0 %v1554_v45 }
 0x2e0   :  { %1980 = vmatpush3.msra.mxu1 %v1562_v47  ;;  %1960 = vmatprep.subr.mxu0 %v2067_v24 }
 0x2e1   :  { %1981 = vmatprep.subr.mxu1 %v2067_v24  ;;  %1961 = vmatpush3.msra.mxu0 %v1553_v48 }
 0x2e2   :  { %1982 = vmatpush3.msra.mxu1 %v1561_v49  ;;  %1962 = vmatprep.subr.mxu0 %v2067_v24 }
 0x2e3   :  { %1983 = vmatprep.subr.mxu1 %v2067_v24  ;;  %1963 = vmatpush3.msra.mxu0 %v1552_v50 }
 0x2e4   :  { %1984 = vmatpush3.msra.mxu1 %v1560_v52  ;;  %1964 = vmatprep.subr.mxu0 %v2067_v24 }
 0x2e5   :  { %1985 = vmatprep.subr.mxu1 %v2067_v24  ;;  %1965 = vmatpush3.msra.mxu0 %v1551_v53 }
 0x2e6   :  { %1986 = vmatpush3.msra.mxu1 %v1559_v54  ;;  %1987 = vmatprep.mubr.msk.f32.mxu1 %vm2069_vm3, %v2067_v24 }
 0x2e7   :  { %1966 = vmatprep.subr.mxu0 %v2067_v24  ;;  %1988 = vmatmul.mubr.msk.f32.vlgmr.msra.gmra.mxu1 %vm714_vm4, %v1117_v55 }
 0x2e8   :  { %2009 = vmatprep.subr.mxu1 %v2067_v24  ;;  %1967 = vmatpush3.msra.mxu0 %v1550_v56 }
 0x2e9   :  { %1968 = vmatprep.mubr.msk.f32.mxu0 %vm2069_vm3, %v2067_v24  ;;  %2010 = vmatpush3.msra.mxu1 %v1584_v57 }
 0x2ea   :  { %1969 = vmatmul.mubr.msk.f32.vlgmr.msra.gmra.mxu0 %vm714_vm4, %v2555_v51  ;;  %1990 = vmatprep.subr.mxu0 %v2067_v24 }
 0x2eb   :  { %2011 = vmatprep.subr.mxu1 %v2067_v24  ;;  %1991 = vmatpush3.msra.mxu0 %v1575_v58 }
 0x2ec   :  { %2012 = vmatpush3.msra.mxu1 %v1583_v59  ;;  %1992 = vmatprep.subr.mxu0 %v2067_v24 }
 0x2ed   :  { %2013 = vmatprep.subr.mxu1 %v2067_v24  ;;  %1993 = vmatpush3.msra.mxu0 %v1574_v60 }
 0x2ee   :  { %2014 = vmatpush3.msra.mxu1 %v1582_v61  ;;  %1994 = vmatprep.subr.mxu0 %v2067_v24 }
 0x2ef   :  { %2015 = vmatprep.subr.mxu1 %v2067_v24  ;;  %1995 = vmatpush3.msra.mxu0 %v1573_v62 }
 0x2f0   :  { %2016 = vmatpush3.msra.mxu1 %v1581_v63  ;;  %1996 = vmatprep.subr.mxu0 %v2067_v24 }
 0x2f1   :  { %2017 = vmatprep.subr.mxu1 %v2067_v24  ;;  %1997 = vmatpush3.msra.mxu0 %v1572_v0 }
 0x2f2   :  { %2018 = vmatpush3.msra.mxu1 %v1580_v1  ;;  %1998 = vmatprep.subr.mxu0 %v2067_v24 }
 0x2f3   :  { %2019 = vmatprep.subr.mxu1 %v2067_v24  ;;  %1999 = vmatpush3.msra.mxu0 %v1571_v2 }
 0x2f4   :  { %2020 = vmatpush3.msra.mxu1 %v1579_v3  ;;  %2000 = vmatprep.subr.mxu0 %v2067_v24 }
 0x2f5   :  { %2021 = vmatprep.subr.mxu1 %v2067_v24  ;;  %2001 = vmatpush3.msra.mxu0 %v1570_v4 }
 0x2f6   :  { %2022 = vmatpush3.msra.mxu1 %v1578_v5  ;;  %2002 = vmatprep.subr.mxu0 %v2067_v24 }
 0x2f7   :  { %2023 = vmatprep.subr.mxu1 %v2067_v24  ;;  %2003 = vmatpush3.msra.mxu0 %v1569_v6 }
 0x2f8   :  { %2024 = vmatpush3.msra.mxu1 %v1577_v7  ;;  %2025 = vmatprep.mubr.msk.f32.mxu1 %vm2069_vm3, %v2067_v24 }
 0x2f9   :  { %2004 = vmatprep.subr.mxu0 %v2067_v24  ;;  %2026 = vmatmul.mubr.msk.f32.vlgmr.msra.gmra.mxu1 %vm714_vm4, %v1283_v8 }
 0x2fa   :  { %2005 = vmatpush3.msra.mxu0 %v1568_v9  ;;  %2006 = vmatprep.mubr.msk.f32.mxu0 %vm2069_vm3, %v2067_v24 }
 0x2fb   :  { %2007 = vmatmul.mubr.msk.f32.vlgmr.msra.gmra.mxu0 %vm714_vm4, %v1200_v10  ;;  %2028 = vmatprep.subr.mxu0 %v2067_v24 }
 0x2fc   :  { %2036 = vmatprep.mubr.msk.f32.mxu0 %vm2069_vm3, %v2067_v24  ;;  %2029 = vmatpush3.msra.mxu0 %v1369_v11 }
 0x2fd   :  { %2030 = vmatprep.subr.mxu0 %v2067_v24 }
 0x2fe   :  { %2031 = vmatpush3.msra.mxu0 %v1368_v12 }
 0x2ff   :  { %2032 = vmatprep.subr.mxu0 %v2067_v24 }
 0x300   :  { %2033 = vmatpush3.msra.mxu0 %v1367_v13 }
 0x301   :  { %2034 = vmatprep.subr.mxu0 %v2067_v24 }
 0x302   :  { %2035 = vmatpush3.msra.mxu0 %v1366_v14 }
 0x385   :  { %v855_v15 = vpop.f32.mrf.mxu1 }
 0x387   :  { %v783_v16 = vpop.f32.mrf.mxu0  ;;  %v1913_v17 = vpop.f32.mrf.mxu1 }
 0x388   :  { %v856_v28 = vadd.f32 %v855_v15, %v783_v16 }
 0x389   :  { %v1894_v18 = vpop.f32.mrf.mxu0 }
 0x395   :  { %v1020_v19 = vpop.f32.mrf.mxu1 }
 0x397   :  { %v1951_v20 = vpop.f32.mrf.mxu1 }
 0x398   :  { %v937_v21 = vpop.f32.mrf.mxu0 }
 0x399   :  { %v941_v29 = vadd.f32 %v937_v21, %v856_v28 }
 0x39a   :  { %v1932_v22 = vpop.f32.mrf.mxu0 }
 0x39b   :  { %v1024_v24 = vadd.f32 %v1020_v19, %v941_v29 }
 0x3a7   :  { %v1186_v23 = vpop.f32.mrf.mxu1 }
 0x3a9   :  { %v1989_v25 = vpop.f32.mrf.mxu1 }
 0x3aa   :  { %v1103_v26 = vpop.f32.mrf.mxu0 }
 0x3ab   :  { %v1107_v30 = vadd.f32 %v1103_v26, %v1024_v24 }
 0x3ac   :  { %v1970_v27 = vpop.f32.mrf.mxu0 }
 0x3ad   :  { %v1190_v32 = vadd.f32 %v1186_v23, %v1107_v30 }
 0x3b9   :  { %v1352_v31 = vpop.f32.mrf.mxu1 }
 0x3bb   :  { %v1269_v33 = vpop.f32.mrf.mxu0  ;;  %v2027_v34 = vpop.f32.mrf.mxu1 }
 0x3bc   :  { %v1273_v35 = vadd.f32 %v1269_v33, %v1190_v32 }
 0x3bd   :  { %v2008_v37 = vpop.f32.mrf.mxu0 }
 0x3be   :  { %v1356_v38 = vadd.f32 %v1352_v31, %v1273_v35 }
 0x3c0   :  { %v1364_v39 = vadd.f32 %v1586_v36, %v1356_v38 }
 0x3c2   :  { %v1365_v40 = vmax.f32 %v1364_v39, 0.0 }
 0x3c4   :  { %2037 = vmatmul.mubr.msk.f32.vlgmr.msra.gmra.mxu0 %vm1377_vm5, %v1365_v40 }
 0x484   :  { %v1447_v42 = vpop.f32.mrf.mxu0 }
 0x485   :  { %v1448_v43 = vadd.f32 %v1587_v41, %v1447_v42 }
 0x486   :  { %v2038_v44 = vpop.f32.mrf.mxu0 }
 0x487   :  { %v1451_v45 = vmax.f32 %v1448_v43, 0.0 }
 0x489   :  { %1453 = vst.msk [vmem:[#allocation3] sm:$0x3] %vm1452_vm6, %v1451_v45 }
 0x48a   :  { %2055 = shalt.err (!%p2052_p4)
}
 0x48b   :  { %1463 = dma.vmem_to_hbm [thread:$0]  %s1461_s24, 32, %s2691_s9, [#allocation4]  }
 0x48c   :  { %2064 = dma.done.wait [#allocation4], 32  }
 0x48d   :  { %2065 = vsyncadd [#allocation4], 4294967264 }
 0x48e   :  { %1467 = vsyncpa [#allocation4], 1 }

</bundles_post_ra>
